<compile_context>
chip_gen: v7x
topology: tpu7x:2x2x1
jax: 0.10.0
libtpu: 0.0.40
codegen_flags: <defaults>
</compile_context>

<pallas_src>
import jax
import jax.numpy as jnp
from jax.experimental import pallas as pl
from jax.experimental.pallas import tpu as pltpu


def _mlp_kernel(x_ref, w1_ref, b1_ref, w2_ref, b2_ref, w3_ref, b3_ref, o_ref):
    # Whole 3-layer MLP for a (tm, in_dim) batch tile, fused in VMEM.
    # bf16 operands feed the MXU; accumulation, bias add and ReLU stay f32 (v5e-safe).
    x = x_ref[...].astype(jnp.bfloat16)
    h1 = jnp.dot(x, w1_ref[...], preferred_element_type=jnp.float32) + b1_ref[...]
    h1 = jnp.maximum(h1, 0.0)
    h2 = jnp.dot(h1.astype(jnp.bfloat16), w2_ref[...],
                 preferred_element_type=jnp.float32) + b2_ref[...]
    h2 = jnp.maximum(h2, 0.0)
    out = jnp.dot(h2.astype(jnp.bfloat16), w3_ref[...],
                  preferred_element_type=jnp.float32) + b3_ref[...]
    o_ref[...] = out.astype(o_ref.dtype)


def _round_up(n, m):
    return (n + m - 1) // m * m


def prepare_params(params):
    """One-time param prep (outside the inference hot path):
    weights -> bf16 for the MXU, biases -> f32 row vectors (1, n)."""
    return {
        "w1": params["w1"].astype(jnp.bfloat16),
        "b1": params["b1"].reshape(1, -1).astype(jnp.float32),
        "w2": params["w2"].astype(jnp.bfloat16),
        "b2": params["b2"].reshape(1, -1).astype(jnp.float32),
        "w3": params["w3"].astype(jnp.bfloat16),
        "b3": params["b3"].reshape(1, -1).astype(jnp.float32),
    }


def feedforward_nn(x, prepared, *, tm_max=2048):
    """x: (batch, in_dim) float32. prepared: output of prepare_params."""
    w1, b1 = prepared["w1"], prepared["b1"]
    w2, b2 = prepared["w2"], prepared["b2"]
    w3, b3 = prepared["w3"], prepared["b3"]

    batch, in_dim = x.shape
    hidden = w1.shape[1]
    out_dim = w3.shape[1]

    # Batch tiling: bound padding waste (tm ~ batch / n_steps, rounded to sublanes),
    # and keep at least 2 grid steps whenever possible so v7x's 2 TensorCores both
    # get work along the "parallel" batch axis (harmless on single-TC v5e/v6e).
    n_steps = max(pl.cdiv(batch, tm_max), 2 if batch >= 16 else 1)
    tm = min(_round_up(pl.cdiv(batch, n_steps), 8), tm_max)
    grid = (pl.cdiv(batch, tm),)

    return pl.pallas_call(
        _mlp_kernel,
        out_shape=jax.ShapeDtypeStruct((batch, out_dim), jnp.float32),
        grid=grid,
        in_specs=[
            # x: tiled on batch only; last block dim equals the full array dim.
            pl.BlockSpec((tm, in_dim), lambda i: (i, 0)),
            # Weights/biases: full blocks, constant index -> VMEM-resident across steps.
            pl.BlockSpec((in_dim, hidden), lambda i: (0, 0)),
            pl.BlockSpec((1, hidden), lambda i: (0, 0)),
            pl.BlockSpec((hidden, hidden), lambda i: (0, 0)),
            pl.BlockSpec((1, hidden), lambda i: (0, 0)),
            pl.BlockSpec((hidden, out_dim), lambda i: (0, 0)),
            pl.BlockSpec((1, out_dim), lambda i: (0, 0)),
        ],
        # Output at native out_dim width: no padded slab, no post-hoc slice pass.
        out_specs=pl.BlockSpec((tm, out_dim), lambda i: (i, 0)),
        compiler_params=pltpu.CompilerParams(
            dimension_semantics=("parallel",),
            vmem_limit_bytes=32 * 1024 * 1024,
        ),
    )(x, w1, b1, w2, b2, w3, b3)


def init_params(key, in_dim, out_dim, hidden=64):
    """Deterministic init mimicking nn.Linear default: U(-1/sqrt(fan_in), 1/sqrt(fan_in))."""
    keys = jax.random.split(key, 6)

    def linear(kw, kb, fan_in, fan_out):
        bound = 1.0 / jnp.sqrt(jnp.float32(fan_in))
        w = jax.random.uniform(kw, (fan_in, fan_out), jnp.float32, -bound, bound)
        b = jax.random.uniform(kb, (1, fan_out), jnp.float32, -bound, bound)
        return w, b

    w1, b1 = linear(keys[0], keys[1], in_dim, hidden)
    w2, b2 = linear(keys[2], keys[3], hidden, hidden)
    w3, b3 = linear(keys[4], keys[5], hidden, out_dim)
    return {"w1": w1, "b1": b1, "w2": w2, "b2": b2, "w3": w3, "b3": b3}


def _reference(x, p):
    h1 = jnp.maximum(x @ p["w1"] + p["b1"], 0.0)
    h2 = jnp.maximum(h1 @ p["w2"] + p["b2"], 0.0)
    return h2 @ p["w3"] + p["b3"]


if __name__ == "__main__":
    key = jax.random.PRNGKey(0)
    k_x, k_p = jax.random.split(key)

    batch, in_dim, out_dim = 8, 32, 4  # small shapes consistent with the module
    x = jax.random.normal(k_x, (batch, in_dim), dtype=jnp.float32)
    params = init_params(k_p, in_dim, out_dim)
    prepared = prepare_params(params)  # one-time prep (bf16 weights, f32 biases)

    y = feedforward_nn(x, prepared)
    jax.block_until_ready(y)

    y_ref = _reference(x, params)  # pure f32 reference
    assert y.shape == (batch, out_dim)
    # bf16 matmul operands (f32 accumulation) => small deviation vs. the f32 reference.
    assert jnp.allclose(y, y_ref, atol=3e-2, rtol=3e-2), (
        float(jnp.max(jnp.abs(y - y_ref)))
    )
    print("KERNEL_OK")
</pallas_src>

<mosaic_0001>
module attributes {stable_mosaic.version = 11 : i64} {
  func.func @_mlp_kernel(%arg0: i32, %arg1: memref<8x32xf32, #tpu.memory_space<vmem>>, %arg2: memref<32x64xbf16, #tpu.memory_space<vmem>>, %arg3: memref<1x64xf32, #tpu.memory_space<vmem>>, %arg4: memref<64x64xbf16, #tpu.memory_space<vmem>>, %arg5: memref<1x64xf32, #tpu.memory_space<vmem>>, %arg6: memref<64x4xbf16, #tpu.memory_space<vmem>>, %arg7: memref<1x4xf32, #tpu.memory_space<vmem>>, %arg8: memref<8x4xf32, #tpu.memory_space<vmem>>) attributes {dimension_semantics = [#tpu.dimension_semantics<parallel>], iteration_bounds = array<i64: 1>, scalar_prefetch = 0 : i64, scratch_operands = 0 : i64, tpu.core_type = #tpu.core_type<tc>, window_params = [{transform_indices = @transform_0, window_bounds = array<i64: 8, 32>}, {pipeline_mode = #tpu.pipeline_mode<synchronous>, transform_indices = @transform_1, window_bounds = array<i64: 32, 64>}, {pipeline_mode = #tpu.pipeline_mode<synchronous>, transform_indices = @transform_2, window_bounds = array<i64: 1, 64>}, {pipeline_mode = #tpu.pipeline_mode<synchronous>, transform_indices = @transform_3, window_bounds = array<i64: 64, 64>}, {pipeline_mode = #tpu.pipeline_mode<synchronous>, transform_indices = @transform_4, window_bounds = array<i64: 1, 64>}, {pipeline_mode = #tpu.pipeline_mode<synchronous>, transform_indices = @transform_5, window_bounds = array<i64: 64, 4>}, {pipeline_mode = #tpu.pipeline_mode<synchronous>, transform_indices = @transform_6, window_bounds = array<i64: 1, 4>}, {transform_indices = @transform_7, window_bounds = array<i64: 8, 4>}]} {
    %c0 = arith.constant 0 : index
    %c0_0 = arith.constant 0 : index
    %0 = vector.load %arg1[%c0, %c0_0] : memref<8x32xf32, #tpu.memory_space<vmem>>, vector<8x32xf32>
    %1 = arith.truncf %0 : vector<8x32xf32> to vector<8x32xbf16>
    %c0_1 = arith.constant 0 : index
    %c0_2 = arith.constant 0 : index
    %2 = vector.load %arg2[%c0_1, %c0_2] : memref<32x64xbf16, #tpu.memory_space<vmem>>, vector<32x64xbf16>
    %cst = arith.constant dense<0.000000e+00> : vector<8x64xf32>
    %3 = tpu.matmul %1, %2, %cst {dimension_numbers = #tpu.dot_dimension_numbers<[1], [0], [0], [1], [0, 0, 1, 1], [], []>} : vector<8x32xbf16>, vector<32x64xbf16>, vector<8x64xf32> -> vector<8x64xf32>
    %c0_3 = arith.constant 0 : index
    %c0_4 = arith.constant 0 : index
    %4 = vector.load %arg3[%c0_3, %c0_4] : memref<1x64xf32, #tpu.memory_space<vmem>>, vector<1x64xf32>
    %5 = vector.broadcast %4 : vector<1x64xf32> to vector<8x64xf32>
    %6 = arith.addf %3, %5 : vector<8x64xf32>
    %cst_5 = arith.constant 0.000000e+00 : f32
    %7 = vector.broadcast %cst_5 : f32 to vector<8x64xf32>
    %8 = arith.maximumf %6, %7 : vector<8x64xf32>
    %9 = arith.truncf %8 : vector<8x64xf32> to vector<8x64xbf16>
    %c0_6 = arith.constant 0 : index
    %c0_7 = arith.constant 0 : index
    %10 = vector.load %arg4[%c0_6, %c0_7] : memref<64x64xbf16, #tpu.memory_space<vmem>>, vector<64x64xbf16>
    %cst_8 = arith.constant dense<0.000000e+00> : vector<8x64xf32>
    %11 = tpu.matmul %9, %10, %cst_8 {dimension_numbers = #tpu.dot_dimension_numbers<[1], [0], [0], [1], [0, 0, 1, 1], [], []>} : vector<8x64xbf16>, vector<64x64xbf16>, vector<8x64xf32> -> vector<8x64xf32>
    %c0_9 = arith.constant 0 : index
    %c0_10 = arith.constant 0 : index
    %12 = vector.load %arg5[%c0_9, %c0_10] : memref<1x64xf32, #tpu.memory_space<vmem>>, vector<1x64xf32>
    %13 = vector.broadcast %12 : vector<1x64xf32> to vector<8x64xf32>
    %14 = arith.addf %11, %13 : vector<8x64xf32>
    %cst_11 = arith.constant 0.000000e+00 : f32
    %15 = vector.broadcast %cst_11 : f32 to vector<8x64xf32>
    %16 = arith.maximumf %14, %15 : vector<8x64xf32>
    %17 = arith.truncf %16 : vector<8x64xf32> to vector<8x64xbf16>
    %c0_12 = arith.constant 0 : index
    %c0_13 = arith.constant 0 : index
    %18 = vector.load %arg6[%c0_12, %c0_13] : memref<64x4xbf16, #tpu.memory_space<vmem>>, vector<64x4xbf16>
    %cst_14 = arith.constant dense<0.000000e+00> : vector<8x4xf32>
    %19 = tpu.matmul %17, %18, %cst_14 {dimension_numbers = #tpu.dot_dimension_numbers<[1], [0], [0], [1], [0, 0, 1, 1], [], []>} : vector<8x64xbf16>, vector<64x4xbf16>, vector<8x4xf32> -> vector<8x4xf32>
    %c0_15 = arith.constant 0 : index
    %c0_16 = arith.constant 0 : index
    %20 = vector.load %arg7[%c0_15, %c0_16] : memref<1x4xf32, #tpu.memory_space<vmem>>, vector<1x4xf32>
    %21 = vector.broadcast %20 : vector<1x4xf32> to vector<8x4xf32>
    %22 = arith.addf %19, %21 : vector<8x4xf32>
    %c0_17 = arith.constant 0 : index
    %c0_18 = arith.constant 0 : index
    %23 = vector.load %arg8[%c0_17, %c0_18] : memref<8x4xf32, #tpu.memory_space<vmem>>, vector<8x4xf32>
    tpu.vector_store %arg8[%c0_17, %c0_18], %22 {strides = array<i32>} : memref<8x4xf32, #tpu.memory_space<vmem>>, vector<8x4xf32>,
    return
  }
  func.func @transform_0(%arg0: i32) -> (i32, i32) {
    %c0_i32 = arith.constant 0 : i32
    %c0_i32_0 = arith.constant 0 : i32
    return %arg0, %c0_i32 : i32, i32
  }
  func.func @transform_1(%arg0: i32) -> (i32, i32) {
    %c0_i32 = arith.constant 0 : i32
    %c0_i32_0 = arith.constant 0 : i32
    %c0_i32_1 = arith.constant 0 : i32
    return %c0_i32, %c0_i32_0 : i32, i32
  }
  func.func @transform_2(%arg0: i32) -> (i32, i32) {
    %c0_i32 = arith.constant 0 : i32
    %c0_i32_0 = arith.constant 0 : i32
    %c0_i32_1 = arith.constant 0 : i32
    return %c0_i32, %c0_i32_0 : i32, i32
  }
  func.func @transform_3(%arg0: i32) -> (i32, i32) {
    %c0_i32 = arith.constant 0 : i32
    %c0_i32_0 = arith.constant 0 : i32
    %c0_i32_1 = arith.constant 0 : i32
    return %c0_i32, %c0_i32_0 : i32, i32
  }
  func.func @transform_4(%arg0: i32) -> (i32, i32) {
    %c0_i32 = arith.constant 0 : i32
    %c0_i32_0 = arith.constant 0 : i32
    %c0_i32_1 = arith.constant 0 : i32
    return %c0_i32, %c0_i32_0 : i32, i32
  }
  func.func @transform_5(%arg0: i32) -> (i32, i32) {
    %c0_i32 = arith.constant 0 : i32
    %c0_i32_0 = arith.constant 0 : i32
    %c0_i32_1 = arith.constant 0 : i32
    return %c0_i32, %c0_i32_0 : i32, i32
  }
  func.func @transform_6(%arg0: i32) -> (i32, i32) {
    %c0_i32 = arith.constant 0 : i32
    %c0_i32_0 = arith.constant 0 : i32
    %c0_i32_1 = arith.constant 0 : i32
    return %c0_i32, %c0_i32_0 : i32, i32
  }
  func.func @transform_7(%arg0: i32) -> (i32, i32) {
    %c0_i32 = arith.constant 0 : i32
    %c0_i32_0 = arith.constant 0 : i32
    return %arg0, %c0_i32 : i32, i32
  }
}

</mosaic_0001>

<bundles_post_ra>
// kernel: tpu_custom_call.1
= control target key start
LH: loop header
LB: loop body
LE: loop exit
PB: predicated region body
PF: predicated region fallthrough
CT: control target
= control target key end

     0   :  { %12 = vsyncpa [#allocation3], 0  ;;  %s386_s24 = smov [#allocation2]   ;;  %s487_s0 = inlined_call_operand.vmem [shape: f32[8,32], index: 0, kind: input, shape index: {}]   ;;  %s488_s1 = inlined_call_operand.hbm [shape: bf16[32,64], index: 1, kind: input, shape index: {}]   ;;  %s489_s2 = inlined_call_operand.vmem [shape: f32[1,64], index: 2, kind: input, shape index: {}]   ;;  %s490_s3 = inlined_call_operand.vmem [shape: bf16[64,64], index: 3, kind: input, shape index: {}]   ;;  %s491_s4 = inlined_call_operand.vmem [shape: f32[1,64], index: 4, kind: input, shape index: {}]   ;;  %s492_s5 = inlined_call_operand.vmem [shape: bf16[64,4], index: 5, kind: input, shape index: {}]   ;;  %s493_s6 = inlined_call_operand.vmem [shape: f32[1,4], index: 6, kind: input, shape index: {}]   ;;  %s494_s7 = inlined_call_operand.vmem [shape: f32[8,4], index: 7, kind: output, shape index: {}]  }
   0x1   :  { %s20_s25 = sshll.u32 %s386_s24, 4  ;;  %s362_s28 = scalar_lea.hbm %s488_s1, 256  ;;  %s21_s25 = int_to_ptr.vmem [resolvable:$true] %s20_s25 }
   0x2   :  { %p363_p0 = scmp.ne.s32.totalorder %s488_s1, %s362_s28  ;;  %p366_p1 = scmp.lt.u32.totalorder %s362_s28, %s488_s1 }
   0x4   :  { %p368_p2 = pnand %p366_p1, %p363_p0 }
   0x6   :  { %371 = shalt.err (!%p368_p2)
}
   0x7   :  { %s372_s10 = scalar_lea.vmem %s21_s25, 256  ;;  %p377_p4 = scmp.lt.s32.totalorder %s21_s25, %s21_s25 }
   0x8   :  { %p373_p3 = scmp.ne.s32.totalorder %s21_s25, %s372_s10  ;;  %p378_p5 = scmp.lt.s32.totalorder %s372_s10, %s372_s10 }
   0xa   :  { %p379_p6 = por %p378_p5, %p377_p4 }
   0xc   :  { %p380_p7 = pnand %p379_p6, %p373_p3 }
   0xe   :  { %383 = shalt.err (!%p380_p7)
}
   0xf   :  { %s387_s11 = smov 64   ;;  %s388_s12 = smov 4  }
  0x10   :  { %26 = dma.hbm_to_vmem [thread:$0]  %s488_s1, 256, %s21_s25, [#allocation3], %s387_s11, %s387_s11, %s388_s12  }
  0x11   :  { %384 = dma.done.wait [#allocation3], 256  }
  0x12   :  { %385 = vsyncadd [#allocation3], 4294967040  ;;  %v389_v0 = vmov 0.0   ;;  %vm390_vm0 = vmmov 0   ;;  %v352_v1 = vld [vmem:[#allocation2] sm:$0xff]   ;;  %v353_v2 = vld [vmem:[#allocation2 + $0x8] sm:$0xff]  }
  0x13   :  { %315 = vmatprep.subr.bf16.mxu0 %v389_v0  ;;  %319 = vmatprep.mubr.msk.bf16.mxu0 %vm390_vm0, %v389_v0  ;;  %v41_v3 = vld [vmem:[%s487_s0] sm:$0xff]  ;;  %vm66_vm1 = vcmask 261120   ;;  %v355_v5 = vld [vmem:[%s490_s3 + $0x8] sm:$0xff]   ;;  %v356_v7 = vld [vmem:[%s490_s3 + $0x10] sm:$0xff]   ;;  %vm151_vm2 = vcmask 523264   ;;  %vm279_vm3 = vcmask 31744  }
  0x14   :  { %323 = vmatprep.subr.bf16.mxu1 %v389_v0  ;;  %331 = vmatprep.mubr.msk.bf16.mxu1 %vm390_vm0, %v389_v0  ;;  %v354_v4 = vld [vmem:[%s490_s3] sm:$0xff]   ;;  %v42_v6 = vpack.c.bf16 %v41_v3, %v41_v3  ;;  %v357_v8 = vld [vmem:[%s490_s3 + $0x18] sm:$0xff]   ;;  %v359_v10 = vld [vmem:[%s492_s5 + $0x8] sm:$0xff]  }
  0x15   :  { %316 = vmatpush3.bf16.msra.mxu0 %v352_v1  ;;  %324 = vmatpush3.bf16.msra.mxu1 %v354_v4  ;;  %v358_v9 = vld [vmem:[%s492_s5] sm:$0xff]   ;;  %v360_v19 = vld [vmem:[%s492_s5 + $0x10] sm:$0xff]   ;;  %v361_v20 = vld [vmem:[%s492_s5 + $0x18] sm:$0xff]  }
  0x16   :  { %317 = vmatprep.subr.bf16.mxu0 %v389_v0  ;;  %325 = vmatprep.subr.bf16.mxu1 %v389_v0  ;;  %v286_v11 = vld [vmem:[%s489_s2] ss:$0 sm:$0xff] }
  0x17   :  { %v290_v21 = vld [vmem:[%s491_s4] ss:$0 sm:$0xff] }
  0x18   :  { %v296_v29 = vld [vmem:[%s493_s6] ss:$0 sm:$0xff] }
  0x19   :  { %318 = vmatpush3.bf16.msra.mxu0 %v353_v2  ;;  %326 = vmatpush3.bf16.msra.mxu1 %v355_v5 }
  0x1a   :  { %335 = vmatprep.subr.bf16.mxu0 %v389_v0  ;;  %327 = vmatprep.subr.bf16.mxu1 %v389_v0 }
  0x1c   :  { %320 = vmatmul.mubr.msk.bf16.vlgmr.msra.gmra.mrb[0].mxu0 %vm66_vm1, %v42_v6 }
  0x1d   :  { %343 = vmatprep.mubr.msk.bf16.mxu0 %vm390_vm0, %v389_v0  ;;  %328 = vmatpush3.bf16.msra.mxu1 %v356_v7 }
  0x1e   :  { %329 = vmatprep.subr.bf16.mxu1 %v389_v0  ;;  %336 = vmatpush3.bf16.msra.mxu0 %v358_v9 }
  0x1f   :  { %337 = vmatprep.subr.bf16.mxu0 %v389_v0 }
  0x21   :  { %330 = vmatpush3.bf16.msra.mxu1 %v357_v8 }
  0x22   :  { %338 = vmatpush3.bf16.msra.mxu0 %v359_v10 }
  0x23   :  { %339 = vmatprep.subr.bf16.mxu0 %v389_v0 }
  0x26   :  { %340 = vmatpush3.bf16.msra.mxu0 %v360_v19 }
  0x27   :  { %341 = vmatprep.subr.bf16.mxu0 %v389_v0 }
  0x2a   :  { %342 = vmatpush3.bf16.msra.mxu0 %v361_v20 }
  0xef   :  { %v104_v12 = vpop.f32.mrb[0].mxu0 }
  0xf0   :  { %v105_v13 = vadd.f32 %v286_v11, %v104_v12  ;;  %v321_v14 = vpop.f32.mrb[1].mxu0 }
  0xf1   :  { %v107_v15 = vpop.f32.mrb[2].mxu0 }
  0xf2   :  { %v110_v16 = vmax.f32 %v105_v13, 0.0  ;;  %v322_v17 = vpop.f32.mrb[3].mxu0 }
  0xf4   :  { %v111_v18 = vpack.c.bf16 %v110_v16, %v110_v16 }
  0xf6   :  { %332 = vmatmul.mubr.msk.bf16.vlgmr.msra.gmra.mrb[0].mxu1 %vm151_vm2, %v111_v18 }
 0x1c9   :  { %v189_v22 = vpop.f32.mrb[0].mxu1 }
 0x1ca   :  { %v190_v23 = vadd.f32 %v290_v21, %v189_v22  ;;  %v333_v24 = vpop.f32.mrb[1].mxu1 }
 0x1cb   :  { %v192_v25 = vpop.f32.mrb[2].mxu1 }
 0x1cc   :  { %v195_v26 = vmax.f32 %v190_v23, 0.0  ;;  %v334_v27 = vpop.f32.mrb[3].mxu1 }
 0x1ce   :  { %v196_v28 = vpack.c.bf16 %v195_v26, %v195_v26 }
 0x1d0   :  { %344 = vmatmul.mubr.msk.bf16.vlgmr.msra.gmra.mrb[4].mxu0 %vm151_vm2, %v196_v28 }
 0x2a3   :  { %v273_v30 = vpop.f32.mrb[4].mxu0 }
 0x2a4   :  { %v274_v31 = vadd.f32 %v296_v29, %v273_v30  ;;  %v345_v32 = vpop.f32.mrb[5].mxu0 }
 0x2a5   :  { %v276_v33 = vpop.f32.mrb[6].mxu0 }
 0x2a6   :  { %280 = vst.msk [vmem:[%s494_s7] sm:$0xff] %vm279_vm3, %v274_v31  ;;  %v346_v34 = vpop.f32.mrb[7].mxu0 }
 0x2a7   :  { %285 = vsyncpa [#allocation3], 1 }

</bundles_post_ra>
